<compile_context>
chip_gen: v7x
topology: tpu7x:2x2x1
jax: 0.10.0
libtpu: 0.0.40
codegen_flags: <defaults>
</compile_context>

<pallas_src>
import math

import numpy as np
import jax
import jax.numpy as jnp
from jax.experimental import pallas as pl
from jax.experimental.pallas import tpu as pltpu


# ---------------------------------------------------------------------------
# Parameter setup (deterministic, mirrors diffsptk DST._precompute)
# ---------------------------------------------------------------------------
def _dst_matrix(L: int, dst_type: int) -> np.ndarray:
    """Orthonormal DST matrix W (L, L) such that DST(x) = x @ W."""
    n = np.arange(1, L + 1, dtype=np.float64)
    k = np.arange(1, L + 1, dtype=np.float64)
    if dst_type in (2, 4):
        n = n - 0.5
    if dst_type in (3, 4):
        k = k - 0.5
    n = n * (np.pi / ((L + 1) if dst_type == 1 else L))

    if dst_type == 1:
        z = np.full((1, L), np.sqrt(2.0 / (L + 1)))
    elif dst_type == 2:
        z = np.where(np.arange(L) == L - 1,
                     np.sqrt(1.0 / L), np.sqrt(2.0 / L))[None, :]
    elif dst_type == 3:
        z = np.where(np.arange(L) == L - 1,
                     np.sqrt(1.0 / L), np.sqrt(2.0 / L))[:, None]
    else:  # dst_type == 4
        z = np.full((1, L), np.sqrt(2.0 / L))

    return z * np.sin(np.outer(n, k))


def _idst_matrix(L: int, dst_type: int) -> np.ndarray:
    type2type = {1: 1, 2: 3, 3: 2, 4: 4}
    return _dst_matrix(L, type2type[dst_type])


# ---------------------------------------------------------------------------
# Small helpers
# ---------------------------------------------------------------------------
def _cdiv(a: int, b: int) -> int:
    return (a + b - 1) // b


def _round_up(x: int, m: int) -> int:
    return _cdiv(x, m) * m


def _sublane(itemsize: int) -> int:
    # Second-minor tile granule: f32 -> 8, bf16 -> 16, int8/fp8 -> 32.
    return 8 if itemsize >= 4 else (16 if itemsize == 2 else 32)


def _vmem_budget_bytes():
    """(physical_capacity, tile_budget) — generation aware."""
    try:
        cap = int(pltpu.get_tpu_info().vmem_capacity_bytes)
        if cap <= 0:
            raise ValueError("bad vmem capacity")
    except Exception:
        cap = 64 * 1024 * 1024  # conservative: v7x per-TensorCore VMEM
    # ~70% of physical, capped at 48 MiB (reviewer guidance for v5e/v6e/v7x).
    budget = max(12 * 1024 * 1024, min(int(0.70 * cap), 48 * 1024 * 1024))
    return cap, budget


def _vmem_limit_bytes(cap: int, need_bytes: int) -> int:
    limit = int(1.4 * need_bytes) + (4 << 20)
    limit = max(limit, 32 << 20)
    return min(limit, int(0.85 * cap))


def _prefers_256_lanes() -> bool:
    """True on chips with a 256-wide MXU (v6e / v7x); False on v2-v5."""
    try:
        kind = jax.devices()[0].device_kind.lower()
    except Exception:
        return False
    return not any(tag in kind for tag in ("v2", "v3", "v4", "v5"))


_FOLD_MAX_WIDTH = 1024  # cap on g*L for the block-diagonal fold


# ---------------------------------------------------------------------------
# Kernels
# ---------------------------------------------------------------------------
def _idst_resident_kernel(y_ref, w_ref, o_ref):
    # (tb, Leff) @ (Leff, Leff) -> (tb, Leff); W is fully resident.
    o_ref[...] = jnp.dot(
        y_ref[...], w_ref[...], preferred_element_type=jnp.float32
    ).astype(o_ref.dtype)


def _idst_tiled_kernel(y_ref, w_ref, o_ref, acc_ref):
    # (tb, tk) @ (tk, tn), accumulated over the K grid axis (last, "arbitrary").
    k = pl.program_id(2)

    @pl.when(k == 0)
    def _():
        acc_ref[...] = jnp.zeros_like(acc_ref)

    acc_ref[...] += jnp.dot(
        y_ref[...], w_ref[...], preferred_element_type=jnp.float32
    )

    @pl.when(k == pl.num_programs(2) - 1)
    def _():
        o_ref[...] = acc_ref[...].astype(o_ref.dtype)


# ---------------------------------------------------------------------------
# Call paths
# ---------------------------------------------------------------------------
def _idst_resident(y_in, W_in, Beff, Leff, itemsize, cap, budget):
    """W fully resident in VMEM; 1-D parallel grid over row blocks."""
    sub = _sublane(itemsize)
    w_bytes = Leff * Leff * itemsize
    io_bytes = lambda t: 4 * t * Leff * itemsize  # y + out, double-buffered each

    # Desired row tile: big (memory-bound; amortize ~0.35us/step), but >= 2 row
    # blocks when possible so a parallel row axis can shard across v7x's 2 TCs.
    tb = max(sub, min(512, _round_up(Beff, sub)))
    if Beff > sub:
        tb = min(tb, max(sub, _round_up(_cdiv(Beff, 2), sub)))

    # Single-buffer W only when double-buffering it would force tb to shrink:
    # its block index is constant, so the second pipeline buffer is dead VMEM.
    single_buffer_w = (2 * w_bytes + io_bytes(tb) > budget
                       and w_bytes + io_bytes(tb) <= budget)
    w_footprint = w_bytes if single_buffer_w else 2 * w_bytes

    while tb > sub and w_footprint + io_bytes(tb) > budget:
        tb = max(sub, _round_up(tb // 2, sub))

    if single_buffer_w:
        w_spec = pl.BlockSpec((Leff, Leff), lambda i: (0, 0),
                              pipeline_mode=pl.Buffered(1))
    else:
        w_spec = pl.BlockSpec((Leff, Leff), lambda i: (0, 0))

    grid = (_cdiv(Beff, tb),)

    cost = pl.CostEstimate(
        flops=2 * Beff * Leff * Leff,
        transcendentals=0,
        bytes_accessed=itemsize * (2 * Beff * Leff + Leff * Leff),
    )
    # Pessimistic limit (W counted twice) so we are safe even if the runtime
    # ignores the single-buffer request.
    vmem_limit = _vmem_limit_bytes(cap, 2 * w_bytes + io_bytes(tb))

    return pl.pallas_call(
        _idst_resident_kernel,
        out_shape=jax.ShapeDtypeStruct((Beff, Leff), y_in.dtype),
        grid=grid,
        in_specs=[
            pl.BlockSpec((tb, Leff), lambda i: (i, 0)),  # row tile of y
            w_spec,                                      # resident W
        ],
        out_specs=pl.BlockSpec((tb, Leff), lambda i: (i, 0)),
        compiler_params=pltpu.CompilerParams(
            dimension_semantics=("parallel",),
            vmem_limit_bytes=vmem_limit,
        ),
        cost_estimate=cost,
    )(y_in, W_in)


def _idst_tiled(y_in, W_in, B, L, itemsize, cap, budget):
    """K/N-tiled path for very large L (W not resident)."""
    dtype = y_in.dtype
    sub = _sublane(itemsize)

    Lp = _round_up(L, 128)
    # Largest K/N tile in {512, 256, 128} that divides the padded length.
    tkn = 512 if Lp % 512 == 0 else (256 if Lp % 256 == 0 else 128)
    tk = tn = tkn

    if Lp != L:
        # Zero-pad the contraction dim: ragged K blocks would otherwise feed
        # uninitialized VMEM into the accumulator.
        y_in = jnp.pad(y_in, ((0, 0), (0, Lp - L)))
        W_in = jnp.pad(W_in, ((0, Lp - L), (0, 0)))  # W: (Lp, L)

    tb = max(sub, min(512, _round_up(B, sub)))
    if B > sub:
        tb = min(tb, max(sub, _round_up(_cdiv(B, 2), sub)))

    def footprint(t):
        return (2 * (t * tk + tk * tn + t * tn) * itemsize  # double-buffered tiles
                + t * tn * 4)                               # f32 accumulator

    while tb > sub and footprint(tb) > budget:
        tb = max(sub, _round_up(tb // 2, sub))

    nb, nn, nk = _cdiv(B, tb), Lp // tn, Lp // tk

    cost = pl.CostEstimate(
        flops=2 * B * Lp * L,
        transcendentals=0,
        # W re-fetched per row block, y per N block (actual pipelined traffic).
        bytes_accessed=itemsize * (nn * B * Lp + nb * Lp * L + B * L),
    )
    vmem_limit = _vmem_limit_bytes(cap, footprint(tb))

    return pl.pallas_call(
        _idst_tiled_kernel,
        out_shape=jax.ShapeDtypeStruct((B, L), dtype),
        grid=(nb, nn, nk),
        in_specs=[
            pl.BlockSpec((tb, tk), lambda i, j, k: (i, k)),
            pl.BlockSpec((tk, tn), lambda i, j, k: (k, j)),
        ],
        out_specs=pl.BlockSpec((tb, tn), lambda i, j, k: (i, j)),
        scratch_shapes=[pltpu.VMEM((tb, tn), jnp.float32)],
        compiler_params=pltpu.CompilerParams(
            dimension_semantics=("parallel", "parallel", "arbitrary"),
            vmem_limit_bytes=vmem_limit,
        ),
        cost_estimate=cost,
    )(y_in, W_in)


def inverse_dst(y: jax.Array, W: jax.Array, *, W_fold=None, fold_group: int = 1,
                force_tiled: bool = False) -> jax.Array:
    """Apply inverse DST to `y` of shape (..., L) using precomputed W (L, L)."""
    orig_shape = y.shape
    L = orig_shape[-1]
    assert W.shape == (L, L)

    dtype = y.dtype
    y2 = y.reshape(-1, L)
    B = y2.shape[0]
    if B == 0:  # empty leading dims: nothing to compute
        return jnp.zeros(orig_shape, dtype)

    itemsize = jnp.dtype(dtype).itemsize
    cap, budget = _vmem_budget_bytes()

    use_fold = (W_fold is not None) and (fold_group > 1) and (not force_tiled)

    if use_fold:
        g = fold_group
        assert W_fold.shape == (g * L, g * L)
        # Pad the batch to a multiple of g instead of abandoning the lane-dense
        # fold (costs at most g-1 zero rows; keeps full-lane output stores).
        pad_rows = (-B) % g
        y2p = jnp.pad(y2, ((0, pad_rows), (0, 0))) if pad_rows else y2
        Beff = (B + pad_rows) // g
        Leff = g * L
        y_in = y2p.reshape(Beff, Leff)
        W_in = W_fold.astype(dtype)     # match input dtype (bf16 fast path)
    else:
        g, pad_rows = 1, 0
        Beff, Leff = B, L
        y_in = y2
        W_in = W.astype(dtype)

    w_bytes = Leff * Leff * itemsize
    resident_ok = use_fold or ((not force_tiled) and w_bytes <= budget // 2)

    if resident_ok:
        out2 = _idst_resident(y_in, W_in, Beff, Leff, itemsize, cap, budget)
    else:
        out2 = _idst_tiled(y_in, W_in, Beff, Leff, itemsize, cap, budget)

    out2 = out2.reshape(B + pad_rows, L)
    if pad_rows:
        out2 = out2[:B]
    return out2.reshape(orig_shape)


# ---------------------------------------------------------------------------
# Module wrapper (mirrors diffsptk.InverseDiscreteSineTransform)
# ---------------------------------------------------------------------------
class InverseDiscreteSineTransform:
    """JAX/Pallas port of diffsptk.InverseDiscreteSineTransform."""

    def __init__(self, dst_length: int, dst_type: int = 2, dtype=jnp.float32):
        assert 1 <= dst_length
        assert 1 <= dst_type <= 4
        self.dst_length = dst_length
        W_np = _idst_matrix(dst_length, dst_type)
        self.W = jnp.asarray(W_np, dtype=dtype)

        # Lane-dense fold: smallest g with (g*L) % 128 == 0, widened to a
        # 256-lane slab when cheap on >= v6e (256-wide MXU), capped so the
        # block-diagonal kron stays small.
        self.fold_group = 1
        self.W_fold = None
        L = dst_length
        if L % 128 != 0:
            g = (L * 128 // math.gcd(L, 128)) // L  # = lcm(L, 128) // L
            if (g * L) % 256 != 0 and 2 * g * L <= 512 and _prefers_256_lanes():
                g *= 2
            if g > 1 and g * L <= _FOLD_MAX_WIDTH:
                self.fold_group = g
                self.W_fold = jnp.asarray(np.kron(np.eye(g), W_np), dtype=dtype)

    def __call__(self, y: jax.Array) -> jax.Array:
        assert y.shape[-1] == self.dst_length, "dimension of input"
        return inverse_dst(y, self.W, W_fold=self.W_fold,
                           fold_group=self.fold_group)


# ---------------------------------------------------------------------------
# Self-test
# ---------------------------------------------------------------------------
if __name__ == "__main__":
    key = jax.random.PRNGKey(0)

    # 1) Small-L fold path (block-diagonal W, batch padding if B % g != 0).
    L = 16
    dst_type = 2
    idst = InverseDiscreteSineTransform(L, dst_type)
    y = jax.random.normal(key, (2, 4, L), dtype=jnp.float32)
    out = jax.block_until_ready(idst(y))
    ref = jnp.matmul(y, idst.W)
    np.testing.assert_allclose(np.asarray(out), np.asarray(ref),
                               rtol=1e-5, atol=1e-5)

    # 2) Round trip IDST(DST(x)) == x (ragged batch not a multiple of the fold).
    W_fwd = jnp.asarray(_dst_matrix(L, dst_type), dtype=jnp.float32)
    x = jax.random.normal(jax.random.PRNGKey(1), (3, 5, L), dtype=jnp.float32)
    x2 = jax.block_until_ready(idst(jnp.matmul(x, W_fwd)))
    np.testing.assert_allclose(np.asarray(x2), np.asarray(x),
                               rtol=1e-4, atol=1e-4)

    # 3) Unfolded resident path (L multiple of 128), ragged last row block.
    L2 = 128
    idst2 = InverseDiscreteSineTransform(L2, 3)
    y2 = jax.random.normal(jax.random.PRNGKey(2), (15, L2), dtype=jnp.float32)
    out2 = jax.block_until_ready(idst2(y2))
    np.testing.assert_allclose(np.asarray(out2),
                               np.asarray(jnp.matmul(y2, idst2.W)),
                               rtol=1e-5, atol=1e-5)

    # 4) Force the large-L K/N-tiled path at a small size (L=320: zero-padded
    #    contraction dim, ragged N block, multi-step accumulation).
    L3 = 320
    W3 = jnp.asarray(_idst_matrix(L3, 2), dtype=jnp.float32)
    y3 = jax.random.normal(jax.random.PRNGKey(3), (16, L3), dtype=jnp.float32)
    out3 = jax.block_until_ready(inverse_dst(y3, W3, force_tiled=True))
    np.testing.assert_allclose(np.asarray(out3), np.asarray(jnp.matmul(y3, W3)),
                               rtol=1e-4, atol=1e-4)

    print("KERNEL_OK")
</pallas_src>

<mosaic_0001>
module attributes {stable_mosaic.version = 11 : i64} {
  func.func @_idst_resident_kernel(%arg0: i32, %arg1: memref<8x256xf32, #tpu.memory_space<vmem>>, %arg2: memref<256x256xf32, #tpu.memory_space<vmem>>, %arg3: memref<8x256xf32, #tpu.memory_space<vmem>>) attributes {dimension_semantics = [#tpu.dimension_semantics<parallel>], iteration_bounds = array<i64: 1>, scalar_prefetch = 0 : i64, scratch_operands = 0 : i64, tpu.core_type = #tpu.core_type<tc>, window_params = [{transform_indices = @transform_0, window_bounds = array<i64: 8, 256>}, {pipeline_mode = #tpu.pipeline_mode<synchronous>, transform_indices = @transform_1, window_bounds = array<i64: 256, 256>}, {transform_indices = @transform_2, window_bounds = array<i64: 8, 256>}]} {
    %c0 = arith.constant 0 : index
    %c0_0 = arith.constant 0 : index
    %0 = vector.load %arg1[%c0, %c0_0] : memref<8x256xf32, #tpu.memory_space<vmem>>, vector<8x256xf32>
    %c0_1 = arith.constant 0 : index
    %c0_2 = arith.constant 0 : index
    %1 = vector.load %arg2[%c0_1, %c0_2] : memref<256x256xf32, #tpu.memory_space<vmem>>, vector<256x256xf32>
    %cst = arith.constant dense<0.000000e+00> : vector<8x256xf32>
    %2 = tpu.matmul %0, %1, %cst {dimension_numbers = #tpu.dot_dimension_numbers<[1], [0], [0], [1], [0, 0, 1, 1], [], []>} : vector<8x256xf32>, vector<256x256xf32>, vector<8x256xf32> -> vector<8x256xf32>
    %c0_3 = arith.constant 0 : index
    %c0_4 = arith.constant 0 : index
    %3 = vector.load %arg3[%c0_3, %c0_4] : memref<8x256xf32, #tpu.memory_space<vmem>>, vector<8x256xf32>
    tpu.vector_store %arg3[%c0_3, %c0_4], %2 {strides = array<i32>} : memref<8x256xf32, #tpu.memory_space<vmem>>, vector<8x256xf32>,
    return
  }
  func.func @transform_0(%arg0: i32) -> (i32, i32) {
    %c0_i32 = arith.constant 0 : i32
    %c0_i32_0 = arith.constant 0 : i32
    return %arg0, %c0_i32 : i32, i32
  }
  func.func @transform_1(%arg0: i32) -> (i32, i32) {
    %c0_i32 = arith.constant 0 : i32
    %c0_i32_0 = arith.constant 0 : i32
    %c0_i32_1 = arith.constant 0 : i32
    return %c0_i32, %c0_i32_0 : i32, i32
  }
  func.func @transform_2(%arg0: i32) -> (i32, i32) {
    %c0_i32 = arith.constant 0 : i32
    %c0_i32_0 = arith.constant 0 : i32
    return %arg0, %c0_i32 : i32, i32
  }
}

</mosaic_0001>

<bundles_post_ra>
// kernel: tpu_custom_call.1
= control target key start
LH: loop header
LB: loop body
LE: loop exit
PB: predicated region body
PF: predicated region fallthrough
CT: control target
= control target key end

     0   :  { %7 = vsyncpa [#allocation3], 0  ;;  %s612_s0 = inlined_call_operand.hbm [shape: f32[1,256], index: 0, kind: input, shape index: {}]   ;;  %s613_s1 = inlined_call_operand.hbm [shape: f32[256,256], index: 1, kind: input, shape index: {}]   ;;  %s614_s2 = inlined_call_operand.hbm [shape: f32[1,256], index: 2, kind: output, shape index: {}]  }
   0x1   :  { %8 = vsyncpa [#allocation6], 0 }
   0x2   :  { %9 = vsyncpa [#allocation4], 0 }
   0x3   :  { %14 = vsyncadd [#allocation3], 224  ;;  %s493_s9 = smov [#allocation2]   ;;  %s421_s13 = scalar_lea.hbm %s612_s0, 32 }
   0x4   :  { %s15_s10 = sshll.u32 %s493_s9, 4  ;;  %p422_p0 = scmp.ne.s32.totalorder %s612_s0, %s421_s13  ;;  %s16_s10 = int_to_ptr.vmem [resolvable:$true] %s15_s10 }
   0x5   :  { %p425_p1 = scmp.lt.u32.totalorder %s421_s13, %s612_s0 }
   0x7   :  { %p427_p2 = pnand %p425_p1, %p422_p0 }
   0x9   :  { %430 = shalt.err (!%p427_p2)
}
   0xa   :  { %s431_s18 = scalar_lea.vmem %s16_s10, 32  ;;  %s435_s19 = scalar_lea.vmem %s16_s10, 256 }
   0xb   :  { %p432_p3 = scmp.ne.s32.totalorder %s16_s10, %s431_s18  ;;  %p436_p4 = scmp.lt.s32.totalorder %s16_s10, %s16_s10 }
   0xc   :  { %p437_p5 = scmp.lt.s32.totalorder %s435_s19, %s431_s18 }
   0xe   :  { %p438_p6 = por %p437_p5, %p436_p4 }
  0x10   :  { %p439_p7 = pnand %p438_p6, %p432_p3 }
  0x12   :  { %442 = shalt.err (!%p439_p7)
}
  0x13   :  { %s494_s20 = smov 32   ;;  %s495_s21 = smov 2  }
  0x14   :  { %21 = dma.hbm_to_vmem [thread:$0]  %s612_s0, 32, %s16_s10, [#allocation3], %s494_s20, %s494_s20, %s495_s21  }
  0x15   :  { %s496_s24 = smov [#allocation5]   ;;  %s443_s28 = scalar_lea.hbm %s613_s1, 8192 }
  0x16   :  { %s27_s25 = sshll.u32 %s496_s24, 4  ;;  %p444_p8 = scmp.ne.s32.totalorder %s613_s1, %s443_s28  ;;  %s28_s25 = int_to_ptr.vmem [resolvable:$true] %s27_s25 }
  0x17   :  { %p447_p9 = scmp.lt.u32.totalorder %s443_s28, %s613_s1 }
  0x19   :  { %p449_p10 = pnand %p447_p9, %p444_p8 }
  0x1b   :  { %452 = shalt.err (!%p449_p10)
}
  0x1c   :  { %s453_s5 = scalar_lea.vmem %s28_s25, 8192  ;;  %p458_p12 = scmp.lt.s32.totalorder %s28_s25, %s28_s25 }
  0x1d   :  { %p454_p11 = scmp.ne.s32.totalorder %s28_s25, %s453_s5  ;;  %p459_p13 = scmp.lt.s32.totalorder %s453_s5, %s453_s5 }
  0x1f   :  { %p460_p0 = por %p459_p13, %p458_p12 }
  0x21   :  { %p461_p1 = pnand %p460_p0, %p454_p11 }
  0x23   :  { %464 = shalt.err (!%p461_p1)
}
  0x24   :  { %s497_s0 = smov 256   ;;  %s498_s6 = smov 16  }
  0x25   :  { %33 = dma.hbm_to_vmem [thread:$0]  %s613_s1, 8192, %s28_s25, [#allocation6], %s497_s0, %s497_s0, %s498_s6  }
  0x26   :  { %487 = dma.done.wait [#allocation3], 256  }
  0x27   :  { %488 = vsyncadd [#allocation3], 4294967040 }
  0x28   :  { %489 = dma.done.wait [#allocation6], 8192  }
  0x29   :  { %490 = vsyncadd [#allocation6], 4294959104  ;;  %v49_v0 = vld [vmem:[#allocation5 + $0x8] sm:$0xff]  ;;  %v51_v1 = vld [vmem:[#allocation5 + $0x18] sm:$0xff]  ;;  %v499_v26 = vmov 1966171168   ;;  %v127_v28 = vlaneseq }
  0x2a   :  { %v48_v2 = vld [vmem:[#allocation5] sm:$0xff]  ;;  %v349_v3 = vpack.c.bf16 %v51_v1, %v49_v0  ;;  %v50_v4 = vld [vmem:[#allocation5 + $0x10] sm:$0xff]  ;;  %v53_v5 = vld [vmem:[#allocation5 + $0x28] sm:$0xff]  ;;  %v125_v27 = vunpack.c.l.s4 %v499_v26 }
  0x2b   :  { %v55_v6 = vld [vmem:[#allocation5 + $0x38] sm:$0xff]  ;;  %v351_v7 = vpack.c.bf16 %v50_v4, %v48_v2  ;;  %v52_v9 = vld [vmem:[#allocation5 + $0x20] sm:$0xff]  ;;  %v54_v10 = vld [vmem:[#allocation5 + $0x30] sm:$0xff]  ;;  %v128_v36 = vshrl.u32 %v127_v28, 7  ;;  %vm573_vm0 = vcmp.lt.s32.totalorder %v127_v28, 256 }
  0x2c   :  { %v353_v8 = vpack.c.bf16 %v55_v6, %v53_v5  ;;  %v57_v11 = vld [vmem:[#allocation5 + $0x48] sm:$0xff]  ;;  %350 = vmatprep.subr.bf16.mxu0 %v349_v3  ;;  %v59_v12 = vld [vmem:[#allocation5 + $0x58] sm:$0xff]  ;;  %v355_v13 = vpack.c.bf16 %v54_v10, %v52_v9  ;;  %v56_v15 = vld [vmem:[#allocation5 + $0x40] sm:$0xff]  ;;  %v126_v35 = vunpack.c.0.s8 %v125_v27 }
  0x2d   :  { %352 = vmatpush1.bf16.msra.mxu0 %v351_v7  ;;  %v357_v14 = vpack.c.bf16 %v59_v12, %v57_v11  ;;  %v58_v16 = vld [vmem:[#allocation5 + $0x50] sm:$0xff]  ;;  %v61_v17 = vld [vmem:[#allocation5 + $0x68] sm:$0xff]  ;;  %v63_v18 = vld [vmem:[#allocation5 + $0x78] sm:$0xff] }
  0x2e   :  { %354 = vmatprep.subr.bf16.mxu0 %v353_v8  ;;  %v359_v19 = vpack.c.bf16 %v58_v16, %v56_v15  ;;  %v361_v20 = vpack.c.bf16 %v63_v18, %v61_v17  ;;  %v60_v21 = vld [vmem:[#allocation5 + $0x60] sm:$0xff]  ;;  %v62_v22 = vld [vmem:[#allocation5 + $0x70] sm:$0xff]  ;;  %v65_v23 = vld [vmem:[#allocation5 + $0x88] sm:$0xff]  ;;  %v544_v46 = vsub.s32 %v126_v35, %v128_v36 }
  0x2f   :  { %v67_v24 = vld [vmem:[#allocation5 + $0x98] sm:$0xff]  ;;  %v363_v25 = vpack.c.bf16 %v62_v22, %v60_v21  ;;  %v64_v30 = vld [vmem:[#allocation5 + $0x80] sm:$0xff]  ;;  %v66_v31 = vld [vmem:[#allocation5 + $0x90] sm:$0xff] }
  0x30   :  { %v365_v29 = vpack.c.bf16 %v67_v24, %v65_v23  ;;  %v69_v32 = vld [vmem:[#allocation5 + $0xa8] sm:$0xff]  ;;  %v71_v33 = vld [vmem:[#allocation5 + $0xb8] sm:$0xff]  ;;  %v367_v34 = vpack.c.bf16 %v66_v31, %v64_v30  ;;  %v68_v38 = vld [vmem:[#allocation5 + $0xa0] sm:$0xff] }
  0x31   :  { %356 = vmatpush1.bf16.msra.mxu0 %v355_v13  ;;  %v369_v37 = vpack.c.bf16 %v71_v33, %v69_v32  ;;  %v70_v39 = vld [vmem:[#allocation5 + $0xb0] sm:$0xff]  ;;  %v73_v40 = vld [vmem:[#allocation5 + $0xc8] sm:$0xff]  ;;  %v75_v41 = vld [vmem:[#allocation5 + $0xd8] sm:$0xff] }
  0x32   :  { %358 = vmatprep.subr.bf16.mxu0 %v357_v14  ;;  %v371_v42 = vpack.c.bf16 %v70_v39, %v68_v38  ;;  %v72_v43 = vld [vmem:[#allocation5 + $0xc0] sm:$0xff]  ;;  %v74_v44 = vld [vmem:[#allocation5 + $0xd0] sm:$0xff]  ;;  %v77_v45 = vld [vmem:[#allocation5 + $0xe8] sm:$0xff]  ;;  %v373_v47 = vpack.c.bf16 %v75_v41, %v73_v40 }
  0x33   :  { %v79_v48 = vld [vmem:[#allocation5 + $0xf8] sm:$0xff]  ;;  %v40_v49 = vld [vmem:[#allocation2] sm:$0x3]  ;;  %v41_v50 = vld [vmem:[#allocation2 + $0x2] sm:$0x3]  ;;  %v375_v59 = vpack.c.bf16 %v74_v44, %v72_v43 }
  0x34   :  { %v42_v51 = vld [vmem:[#allocation2 + $0x4] sm:$0x3]  ;;  %v43_v52 = vld [vmem:[#allocation2 + $0x6] sm:$0x3]  ;;  %v44_v53 = vld [vmem:[#allocation2 + $0x8] sm:$0x3]  ;;  %v120_v54 = vcombine.low %v40_v49, %v41_v50  ;;  %v377_v63 = vpack.c.bf16 %v79_v48, %v77_v45 }
  0x35   :  { %360 = vmatpush1.bf16.msra.mxu0 %v359_v19  ;;  %v45_v55 = vld [vmem:[#allocation2 + $0xa] sm:$0x3]  ;;  %v46_v56 = vld [vmem:[#allocation2 + $0xc] sm:$0x3]  ;;  %v47_v57 = vld [vmem:[#allocation2 + $0xe] sm:$0x3]  ;;  %v121_v58 = vcombine.low %v42_v51, %v43_v52 }
  0x36   :  { %362 = vmatprep.subr.bf16.mxu0 %v361_v20  ;;  %v122_v60 = vcombine.low %v44_v53, %v45_v55  ;;  %v123_v61 = vcombine.low %v46_v56, %v47_v57  ;;  %v547_v62 = vrot.slane %v120_v54, %v544_v46  ;;  %v76_v0 = vld [vmem:[#allocation5 + $0xe0] sm:$0xff]  ;;  %v78_v1 = vld [vmem:[#allocation5 + $0xf0] sm:$0xff]  ;;  %v81_v3 = vld [vmem:[#allocation5 + $0x108] sm:$0xff] }
  0x37   :  { %v550_v2 = vrot.slane %v121_v58, %v544_v46  ;;  %v83_v4 = vld [vmem:[#allocation5 + $0x118] sm:$0xff]  ;;  %v379_v8 = vpack.c.bf16 %v78_v1, %v76_v0  ;;  %v80_v11 = vld [vmem:[#allocation5 + $0x100] sm:$0xff]  ;;  %v82_v12 = vld [vmem:[#allocation5 + $0x110] sm:$0xff] }
  0x38   :  { %v553_v5 = vrot.slane %v122_v60, %v544_v46  ;;  %v556_v6 = vrot.slane %v123_v61, %v544_v46  ;;  %v381_v10 = vpack.c.bf16 %v83_v4, %v81_v3  ;;  %v85_v14 = vld [vmem:[#allocation5 + $0x128] sm:$0xff]  ;;  %v87_v15 = vld [vmem:[#allocation5 + $0x138] sm:$0xff]  ;;  %v383_v17 = vpack.c.bf16 %v82_v12, %v80_v11  ;;  %v84_v20 = vld [vmem:[#allocation5 + $0x120] sm:$0xff] }
  0x39   :  { %364 = vmatpush1.bf16.msra.mxu0 %v363_v25  ;;  %v153_v7 = vcombine.high %v547_v62, %v550_v2  ;;  %v385_v19 = vpack.c.bf16 %v87_v15, %v85_v14  ;;  %v86_v21 = vld [vmem:[#allocation5 + $0x130] sm:$0xff]  ;;  %v89_v22 = vld [vmem:[#allocation5 + $0x148] sm:$0xff]  ;;  %v91_v23 = vld [vmem:[#allocation5 + $0x158] sm:$0xff]  ;;  %v152_v56 = vcombine.low %v547_v62, %v550_v2 }
  0x3a   :  { %366 = vmatprep.subr.bf16.mxu0 %v365_v29  ;;  %v155_v9 = vcombine.high %v553_v5, %v556_v6  ;;  %v387_v24 = vpack.c.bf16 %v86_v21, %v84_v20  ;;  %v389_v25 = vpack.c.bf16 %v91_v23, %v89_v22  ;;  %v88_v26 = vld [vmem:[#allocation5 + $0x140] sm:$0xff]  ;;  %v90_v27 = vld [vmem:[#allocation5 + $0x150] sm:$0xff]  ;;  %v93_v29 = vld [vmem:[#allocation5 + $0x168] sm:$0xff]  ;;  %v154_v57 = vcombine.low %v553_v5, %v556_v6 }
  0x3b   :  { %v169_v13 = vrot.slane %v153_v7, %v544_v46  ;;  %v95_v30 = vld [vmem:[#allocation5 + $0x178] sm:$0xff]  ;;  %v391_v31 = vpack.c.bf16 %v90_v27, %v88_v26  ;;  %v92_v33 = vld [vmem:[#allocation5 + $0x160] sm:$0xff]  ;;  %v97_v35 = vld [vmem:[#allocation5 + $0x188] sm:$0xff] }
  0x3c   :  { %v183_v16 = vrot.slane %v155_v9, %v544_v46  ;;  %v393_v32 = vpack.c.bf16 %v95_v30, %v93_v29  ;;  %v99_v36 = vld [vmem:[#allocation5 + $0x198] sm:$0xff]  ;;  %v96_v39 = vld [vmem:[#allocation5 + $0x180] sm:$0xff]  ;;  %v98_v40 = vld [vmem:[#allocation5 + $0x190] sm:$0xff]  ;;  %v176_v0 = vrot.slane %v154_v57, %v544_v46 }
  0x3d   :  { %368 = vmatpush1.bf16.msra.mxu0 %v367_v34  ;;  %v94_v34 = vld [vmem:[#allocation5 + $0x170] sm:$0xff]  ;;  %v397_v38 = vpack.c.bf16 %v99_v36, %v97_v35  ;;  %v101_v41 = vld [vmem:[#allocation5 + $0x1a8] sm:$0xff]  ;;  %v399_v43 = vpack.c.bf16 %v98_v40, %v96_v39  ;;  %v100_v45 = vld [vmem:[#allocation5 + $0x1a0] sm:$0xff] }
  0x3e   :  { %370 = vmatprep.subr.bf16.mxu0 %v369_v37  ;;  %v185_v18 = vcombine.low %v169_v13, %v183_v16  ;;  %v395_v37 = vpack.c.bf16 %v94_v34, %v92_v33  ;;  %v105_v48 = vld [vmem:[#allocation5 + $0x1c8] sm:$0xff]  ;;  %v107_v49 = vld [vmem:[#allocation5 + $0x1d8] sm:$0xff]  ;;  %v104_v52 = vld [vmem:[#allocation5 + $0x1c0] sm:$0xff] }
  0x3f   :  { %v405_v51 = vpack.c.bf16 %v107_v49, %v105_v48  ;;  %v106_v53 = vld [vmem:[#allocation5 + $0x1d0] sm:$0xff]  ;;  %v109_v54 = vld [vmem:[#allocation5 + $0x1e8] sm:$0xff]  ;;  %v111_v55 = vld [vmem:[#allocation5 + $0x1f8] sm:$0xff] }
  0x40   :  { %252 = vmatprep.mubr.f32.mxu0 %v185_v18  ;;  %v407_v58 = vpack.c.bf16 %v106_v53, %v104_v52  ;;  %v108_v60 = vld [vmem:[#allocation5 + $0x1e0] sm:$0xff]  ;;  %v110_v61 = vld [vmem:[#allocation5 + $0x1f0] sm:$0xff] }
  0x41   :  { %372 = vmatpush1.bf16.msra.mxu0 %v371_v42  ;;  %v103_v42 = vld [vmem:[#allocation5 + $0x1b8] sm:$0xff]  ;;  %v411_v1 = vpack.c.bf16 %v110_v61, %v108_v60 }
  0x42   :  { %374 = vmatprep.subr.bf16.mxu0 %v373_v47  ;;  %v401_v44 = vpack.c.bf16 %v103_v42, %v101_v41  ;;  %v102_v47 = vld [vmem:[#allocation5 + $0x1b0] sm:$0xff] }
  0x43   :  { %v403_v50 = vpack.c.bf16 %v102_v47, %v100_v45 }
  0x45   :  { %376 = vmatpush1.bf16.msra.mxu0 %v375_v59  ;;  %v409_v59 = vpack.c.bf16 %v111_v55, %v109_v54 }
  0x46   :  { %378 = vmatprep.subr.bf16.mxu0 %v377_v63  ;;  %v162_v63 = vrot.slane %v152_v56, %v544_v46 }
  0x48   :  { %v184_v3 = vcombine.low %v162_v63, %v176_v0 }
  0x49   :  { %380 = vmatpush1.bf16.msra.mxu0 %v379_v8 }
  0x4a   :  { %382 = vmatprep.subr.bf16.mxu0 %v381_v10 }
  0x4d   :  { %384 = vmatpush1.bf16.msra.mxu0 %v383_v17 }
  0x4e   :  { %386 = vmatprep.subr.bf16.mxu0 %v385_v19 }
  0x51   :  { %388 = vmatpush1.bf16.msra.mxu0 %v387_v24 }
  0x52   :  { %390 = vmatprep.subr.bf16.mxu0 %v389_v25 }
  0x55   :  { %392 = vmatpush1.bf16.msra.mxu0 %v391_v31 }
  0x56   :  { %394 = vmatprep.subr.bf16.mxu0 %v393_v32 }
  0x59   :  { %396 = vmatpush1.bf16.msra.mxu0 %v395_v37 }
  0x5a   :  { %398 = vmatprep.subr.bf16.mxu0 %v397_v38 }
  0x5d   :  { %400 = vmatpush1.bf16.msra.mxu0 %v399_v43 }
  0x5e   :  { %402 = vmatprep.subr.bf16.mxu0 %v401_v44 }
  0x61   :  { %404 = vmatpush1.bf16.msra.mxu0 %v403_v50 }
  0x62   :  { %406 = vmatprep.subr.bf16.mxu0 %v405_v51 }
  0x65   :  { %408 = vmatpush1.bf16.msra.mxu0 %v407_v58 }
  0x66   :  { %410 = vmatprep.subr.bf16.mxu0 %v409_v59 }
  0x69   :  { %412 = vmatpush1.bf16.msra.mxu0 %v411_v1 }
  0x6c   :  { %253 = vmatmul.mubr.f32.vlgmr.msra.gmra.mrb[0].mxu0 %v184_v3 }
 0x13f   :  { %v254_v62 = vpop.f32.mrb[0].mxu0 }
 0x140   :  { %v256_v2 = vpop.f32.mrb[1].mxu0 }
 0x141   :  { %v261_v4 = vcombine.low %v254_v62, %v256_v2  ;;  %v262_v5 = vcombine.high %v254_v62, %v256_v2 }
 0x143   :  { %v269_v6 = vrot.slane %v261_v4, %v544_v46  ;;  %v276_v7 = vrot.slane %v262_v5, %v544_v46 }
 0x145   :  { %v277_v9 = vcombine.high %v269_v6, %v269_v6  ;;  %v278_v10 = vcombine.high %v276_v7, %v276_v7  ;;  %v285_v11 = vrot.slane %v269_v6, %v544_v46  ;;  %v292_v12 = vrot.slane %v276_v7, %v544_v46 }
 0x147   :  { %v299_v13 = vrot.slane %v277_v9, %v544_v46  ;;  %v306_v14 = vrot.slane %v278_v10, %v544_v46  ;;  %v307_v15 = vcombine.high %v285_v11, %v285_v11  ;;  %v308_v16 = vcombine.high %v292_v12, %v292_v12  ;;  %323 = vst.msk [vmem:[#allocation7] sm:$0x3] %vm573_vm0, %v285_v11 }
 0x148   :  { %327 = vst.msk [vmem:[#allocation7 + $0x8] sm:$0x3] %vm573_vm0, %v292_v12 }
 0x149   :  { %v309_v28 = vcombine.high %v299_v13, %v299_v13  ;;  %v310_v17 = vcombine.high %v306_v14, %v306_v14  ;;  %324 = vst.msk [vmem:[#allocation7 + $0x2] sm:$0x3] %vm573_vm0, %v299_v13  ;;  %325 = vst.msk [vmem:[#allocation7 + $0x4] sm:$0x3] %vm573_vm0, %v307_v15 }
 0x14a   :  { %328 = vst.msk [vmem:[#allocation7 + $0xa] sm:$0x3] %vm573_vm0, %v306_v14  ;;  %329 = vst.msk [vmem:[#allocation7 + $0xc] sm:$0x3] %vm573_vm0, %v308_v16 }
 0x14b   :  { %326 = vst.msk [vmem:[#allocation7 + $0x6] sm:$0x3] %vm573_vm0, %v309_v28  ;;  %330 = vst.msk [vmem:[#allocation7 + $0xe] sm:$0x3] %vm573_vm0, %v310_v17 }
 0x14c   :  { %335 = vsyncadd [#allocation4], 224  ;;  %s500_s1 = smov [#allocation7]  }
 0x14d   :  { %s336_s9 = sshll.u32 %s500_s1, 4  ;;  %s337_s9 = int_to_ptr.vmem [resolvable:$true] %s336_s9 }
 0x14e   :  { %s465_s10 = scalar_lea.vmem %s337_s9, 32  ;;  %s469_s11 = scalar_lea.vmem %s337_s9, 256 }
 0x14f   :  { %p466_p2 = scmp.ne.s32.totalorder %s337_s9, %s465_s10  ;;  %p470_p3 = scmp.lt.s32.totalorder %s337_s9, %s337_s9 }
 0x150   :  { %p471_p4 = scmp.lt.s32.totalorder %s469_s11, %s465_s10 }
 0x152   :  { %p472_p5 = por %p471_p4, %p470_p3 }
 0x154   :  { %p473_p6 = pnand %p472_p5, %p466_p2 }
 0x156   :  { %476 = shalt.err (!%p473_p6)
}
 0x157   :  { %s477_s14 = scalar_lea.hbm %s614_s2, 32 }
 0x158   :  { %p478_p7 = scmp.ne.s32.totalorder %s614_s2, %s477_s14  ;;  %p481_p8 = scmp.lt.u32.totalorder %s477_s14, %s614_s2 }
 0x15a   :  { %p483_p9 = pnand %p481_p8, %p478_p7 }
 0x15c   :  { %486 = shalt.err (!%p483_p9)
}
 0x15d   :  { %342 = dma.vmem_to_hbm [thread:$0]  %s337_s9, 32, %s614_s2, [#allocation4], %s494_s20, %s494_s20, %s495_s21  }
 0x15e   :  { %491 = dma.done.wait [#allocation4], 256  }
 0x15f   :  { %492 = vsyncadd [#allocation4], 4294967040 }
 0x160   :  { %346 = vsyncpa [#allocation3], 1 }
 0x161   :  { %347 = vsyncpa [#allocation6], 1 }
 0x162   :  { %348 = vsyncpa [#allocation4], 1 }

</bundles_post_ra>
